<compile_context>
chip_gen: v6e
topology: v6e:2x2x1
jax: 0.10.0
libtpu: 0.0.40
codegen_flags: <defaults>
</compile_context>

<pallas_src>
import functools

import jax
import jax.numpy as jnp
from jax import lax
from jax.experimental import pallas as pl
from jax.experimental.pallas import tpu as pltpu


def _centernet_decode_kernel(x_ref, out_ref, *, topk, scale):
    # x_ref:   (1, C, H, W) f32. channels [0, nc) = heatmap,
    #          [nc, nc+2) = wh, [nc+2, nc+4) = reg.
    # out_ref: (1, topk, 6) f32.
    _, C, H, W = x_ref.shape
    nc = C - 4
    R = nc * H          # number of lane-dense heatmap "rows"
    HW = H * W

    xv = x_ref[0]                          # (C, H, W)
    heat3d = xv[:nc]                       # (nc, H, W), W on lanes
    heat2d = heat3d.reshape(R, W)          # (R, W) view for MXU row extraction

    neg_inf = jnp.float32(-jnp.inf)

    # Loop-invariant iotas, hoisted (JAX does not CSE broadcast_in_dim).
    cls_iota = lax.broadcasted_iota(jnp.int32, (nc, H), 0)
    h_iota2d = lax.broadcasted_iota(jnp.int32, (nc, H), 1)
    rflat_iota = cls_iota * H + h_iota2d                      # row id c*H + h
    row_iota_1R = lax.broadcasted_iota(jnp.int32, (1, R), 1)
    col_iota_1W = lax.broadcasted_iota(jnp.int32, (1, W), 1)
    col_iota_kW = lax.broadcasted_iota(jnp.int32, (topk, W), 1)
    h_iota_kH = lax.broadcasted_iota(jnp.int32, (topk, H), 1)
    k_iota = lax.broadcasted_iota(jnp.int32, (topk, 1), 0)

    # Per-row running max (lane reduce over W once).  (nc, H) is lane-dense.
    row_max0 = jnp.max(heat3d, axis=-1)                       # (nc, H)

    def body(k, carry):
        row_max, sel_r, sel_c, scores = carry
        # (a) global max + winning row from the small row-max array.
        m = jnp.max(row_max)
        r_idx = jnp.min(jnp.where(row_max == m, rflat_iota, R))
        # (b) pull the winning row out of the heatmap with a one-hot matvec
        #     on the MXU (one-hot @ f32 reproduces the row exactly).
        row_onehot = (row_iota_1R == r_idx).astype(jnp.float32)      # (1, R)
        row_vals = jnp.dot(row_onehot, heat2d,
                           preferred_element_type=jnp.float32)       # (1, W)
        # Mask columns of this row that were already selected.
        prev_hit = (sel_r == r_idx) & (col_iota_kW == sel_c)         # (topk, W)
        col_mask = jnp.sum(prev_hit.astype(jnp.int32), axis=0,
                           keepdims=True) > 0                        # (1, W)
        row_vals_m = jnp.where(col_mask, neg_inf, row_vals)
        # (c) in-row argmax + update of a single row-max entry (VPU select).
        c_idx = jnp.min(jnp.where(row_vals_m == m, col_iota_1W, W))
        new_rm = jnp.max(jnp.where((col_iota_1W == c_idx) | col_mask,
                                   neg_inf, row_vals))
        row_max = jnp.where(rflat_iota == r_idx, new_rm, row_max)
        sel_r = jnp.where(k_iota == k, r_idx, sel_r)
        sel_c = jnp.where(k_iota == k, c_idx, sel_c)
        scores = jnp.where(k_iota == k, m, scores)
        return row_max, sel_r, sel_c, scores

    init = (row_max0,
            jnp.full((topk, 1), -1, jnp.int32),
            jnp.full((topk, 1), -1, jnp.int32),
            jnp.zeros((topk, 1), jnp.float32))
    _, sel_r, sel_c, scores = lax.fori_loop(0, topk, body, init)

    # ---- index arithmetic (matches torch true-division semantics) ----
    flat = sel_r * W + sel_c                                  # (topk, 1) i32
    tind = flat % HW                                          # topk_indices
    classes = flat.astype(jnp.float32) / jnp.float32(HW)
    ys0 = tind.astype(jnp.float32) / jnp.float32(W)
    xs0 = (tind % W).astype(jnp.float32)

    # ---- two-stage one-hot gather of the 4 tail channels ----
    h_sel = sel_r % H                                          # (topk, 1)
    h_onehot = (h_iota_kH == h_sel).astype(jnp.float32)        # (topk, H)
    w_onehot = (col_iota_kW == sel_c).astype(jnp.float32)      # (topk, W)

    def gather_channel(chan_hw):                               # (H, W)
        rows = jnp.dot(h_onehot, chan_hw,
                       preferred_element_type=jnp.float32)     # (topk, W)
        return jnp.sum(rows * w_onehot, axis=-1, keepdims=True)  # (topk, 1)

    wh_w = gather_channel(xv[nc + 0])     # x[:, -4]
    wh_h = gather_channel(xv[nc + 1])     # x[:, -3]
    reg_x = gather_channel(xv[nc + 2])    # x[:, -2]
    reg_y = gather_channel(xv[nc + 3])    # x[:, -1]

    xs = xs0 + reg_x
    ys = ys0 + reg_y
    half_w = 0.5 * wh_w
    half_h = 0.5 * wh_h
    s = jnp.float32(scale)

    # ---- direct slice stores of the 6 output columns (no lane concat) ----
    out_ref[0, :, 0:1] = (xs - half_w) * s
    out_ref[0, :, 1:2] = (ys - half_h) * s
    out_ref[0, :, 2:3] = (xs + half_w) * s
    out_ref[0, :, 3:4] = (ys + half_h) * s
    out_ref[0, :, 4:5] = classes
    out_ref[0, :, 5:6] = scores


def centernet_heatmap_max_det(x, topk=8, scale=4):
    """x: (B, num_classes + 4, H, W) float32, NCHW (same as PyTorch)."""
    B, C, H, W = x.shape
    x = x.astype(jnp.float32)

    kernel = functools.partial(_centernet_decode_kernel, topk=topk, scale=scale)
    return pl.pallas_call(
        kernel,
        out_shape=jax.ShapeDtypeStruct((B, topk, 6), jnp.float32),
        grid_spec=pltpu.PrefetchScalarGridSpec(
            num_scalar_prefetch=0,
            grid=(B,),
            in_specs=[
                # Raw NCHW slab per batch element: zero wrapper copies,
                # heatmap and wh/reg channels stay lane-dense along W.
                pl.BlockSpec((1, C, H, W), lambda b: (b, 0, 0, 0)),
            ],
            out_specs=pl.BlockSpec((1, topk, 6), lambda b: (b, 0, 0)),
        ),
        compiler_params=pltpu.CompilerParams(
            dimension_semantics=("parallel",)),   # batch is independent
    )(x)


def _reference_decode(x, topk, scale):
    """Pure-JAX reference mirroring the PyTorch forward."""
    B, C, H, W = x.shape
    nc = C - 4
    HW = H * W
    heat = x[:, :nc].reshape(B, -1)
    scores, indices = jax.lax.top_k(heat, topk)
    classes = indices.astype(jnp.float32) / HW
    tind = indices % HW
    ys = tind.astype(jnp.float32) / W
    xs = (tind % W).astype(jnp.float32)
    regx = x[:, -2].reshape(B, HW)
    regy = x[:, -1].reshape(B, HW)
    whw = x[:, -4].reshape(B, HW)
    whh = x[:, -3].reshape(B, HW)
    xs = xs + jnp.take_along_axis(regx, tind, axis=1)
    ys = ys + jnp.take_along_axis(regy, tind, axis=1)
    hw_ = 0.5 * jnp.take_along_axis(whw, tind, axis=1)
    hh_ = 0.5 * jnp.take_along_axis(whh, tind, axis=1)
    bboxes = jnp.stack([xs - hw_, ys - hh_, xs + hw_, ys + hh_], axis=-1)
    bboxes = bboxes * scale
    return jnp.concatenate([bboxes, classes[..., None], scores[..., None]],
                           axis=-1)


if __name__ == "__main__":
    key = jax.random.PRNGKey(0)
    B, num_classes, H, W = 2, 4, 16, 16
    topk, scale = 8, 4
    x = jax.random.normal(key, (B, num_classes + 4, H, W), dtype=jnp.float32)

    out = centernet_heatmap_max_det(x, topk=topk, scale=scale)
    out = jax.block_until_ready(out)

    ref = _reference_decode(x, topk, scale)
    assert out.shape == (B, topk, 6), out.shape
    max_err = float(jnp.max(jnp.abs(out - ref)))
    assert max_err < 1e-4, f"max abs error {max_err}"
    print("KERNEL_OK")
</pallas_src>

<mosaic_0001>
module attributes {stable_mosaic.version = 11 : i64} {
  func.func @_centernet_decode_kernel(%arg0: i32, %arg1: memref<1x8x16x16xf32, #tpu.memory_space<vmem>>, %arg2: memref<1x8x6xf32, #tpu.memory_space<vmem>>) attributes {dimension_semantics = [#tpu.dimension_semantics<parallel>], iteration_bounds = array<i64: 2>, scalar_prefetch = 0 : i64, scratch_operands = 0 : i64, tpu.core_type = #tpu.core_type<tc>, window_params = [{transform_indices = @transform_0, window_bounds = array<i64: 1, 8, 16, 16>}, {transform_indices = @transform_1, window_bounds = array<i64: 1, 8, 6>}]} {
    %c0 = arith.constant 0 : index
    %c0_0 = arith.constant 0 : index
    %c0_1 = arith.constant 0 : index
    %c0_2 = arith.constant 0 : index
    %0 = vector.load %arg1[%c0, %c0_0, %c0_1, %c0_2] : memref<1x8x16x16xf32, #tpu.memory_space<vmem>>, vector<1x8x16x16xf32>
    %1 = vector.shape_cast %0 : vector<1x8x16x16xf32> to vector<8x16x16xf32>
    %2 = vector.extract_strided_slice %1 {offsets = [0, 0, 0], sizes = [4, 16, 16], strides = [1, 1, 1]} : vector<8x16x16xf32> to vector<4x16x16xf32>
    %3 = vector.shape_cast %2 : vector<4x16x16xf32> to vector<64x16xf32>
    %4 = tpu.iota {dimensions = array<i32: 0>} : vector<4x16xi32>
    %5 = tpu.iota {dimensions = array<i32: 1>} : vector<4x16xi32>
    %c16_i32 = arith.constant 16 : i32
    %6 = vector.broadcast %c16_i32 : i32 to vector<4x16xi32>
    %7 = arith.muli %4, %6 : vector<4x16xi32>
    %8 = arith.addi %7, %5 : vector<4x16xi32>
    %9 = tpu.iota {dimensions = array<i32: 1>} : vector<1x64xi32>
    %10 = tpu.iota {dimensions = array<i32: 1>} : vector<1x16xi32>
    %11 = tpu.iota {dimensions = array<i32: 1>} : vector<8x16xi32>
    %12 = tpu.iota {dimensions = array<i32: 1>} : vector<8x16xi32>
    %13 = tpu.iota {dimensions = array<i32: 0>} : vector<8x1xi32>
    %cst = arith.constant dense<0xFF800000> : vector<4x16xf32>
    %14 = vector.multi_reduction <maximumf>, %2, %cst [2] : vector<4x16x16xf32> to vector<4x16xf32>
    %c-1_i32 = arith.constant -1 : i32
    %15 = vector.broadcast %c-1_i32 : i32 to vector<8x1xi32>
    %c-1_i32_3 = arith.constant -1 : i32
    %16 = vector.broadcast %c-1_i32_3 : i32 to vector<8x1xi32>
    %cst_4 = arith.constant 0.000000e+00 : f32
    %17 = vector.broadcast %cst_4 : f32 to vector<8x1xf32>
    %cst_5 = arith.constant 0xFF800000 : f32
    %c0_i32 = arith.constant 0 : i32
    %c8_i32 = arith.constant 8 : i32
    %18 = arith.addi %c0_i32, %c8_i32 : i32
    %c1_i32 = arith.constant 1 : i32
    %19:4 = scf.for %arg3 = %c0_i32 to %18 step %c1_i32 iter_args(%arg4 = %14, %arg5 = %15, %arg6 = %16, %arg7 = %17) -> (vector<4x16xf32>, vector<8x1xi32>, vector<8x1xi32>, vector<8x1xf32>)  : i32 {
      %146 = vector.shape_cast %arg4 : vector<4x16xf32> to vector<1x4x16xf32>
      %cst_54 = arith.constant dense<0xFF800000> : vector<1xf32>
      %147 = vector.multi_reduction <maximumf>, %146, %cst_54 [1, 2] : vector<1x4x16xf32> to vector<1xf32>
      %148 = vector.shape_cast %147 : vector<1xf32> to vector<1x1x1xf32>
      %149 = vector.extract %148[0, 0, 0] : f32 from vector<1x1x1xf32>
      %150 = vector.broadcast %149 : f32 to vector<4x16xf32>
      %151 = arith.cmpf oeq, %arg4, %150 : vector<4x16xf32>
      %c64_i32 = arith.constant 64 : i32
      %152 = vector.broadcast %c64_i32 : i32 to vector<4x16xi32>
      %153 = arith.select %151, %8, %152 : vector<4x16xi1>, vector<4x16xi32>
      %154 = vector.shape_cast %153 : vector<4x16xi32> to vector<1x4x16xi32>
      %cst_55 = arith.constant dense<2147483647> : vector<1xi32>
      %155 = vector.multi_reduction <minsi>, %154, %cst_55 [1, 2] : vector<1x4x16xi32> to vector<1xi32>
      %156 = vector.shape_cast %155 : vector<1xi32> to vector<1x1x1xi32>
      %157 = vector.extract %156[0, 0, 0] : i32 from vector<1x1x1xi32>
      %158 = vector.broadcast %157 : i32 to vector<1x64xi32>
      %159 = arith.cmpi eq, %9, %158 : vector<1x64xi32>
      %160 = arith.extui %159 : vector<1x64xi1> to vector<1x64xi32>
      %161 = arith.sitofp %160 : vector<1x64xi32> to vector<1x64xf32>
      %cst_56 = arith.constant dense<0.000000e+00> : vector<1x16xf32>
      %162 = tpu.matmul %161, %3, %cst_56 {dimension_numbers = #tpu.dot_dimension_numbers<[1], [0], [0], [1], [0, 0, 1, 1], [], []>} : vector<1x64xf32>, vector<64x16xf32>, vector<1x16xf32> -> vector<1x16xf32>
      %163 = vector.broadcast %157 : i32 to vector<8x1xi32>
      %164 = arith.cmpi eq, %arg5, %163 : vector<8x1xi32>
      %165 = vector.broadcast %arg6 : vector<8x1xi32> to vector<8x16xi32>
      %166 = arith.cmpi eq, %11, %165 : vector<8x16xi32>
      %167 = vector.broadcast %164 : vector<8x1xi1> to vector<8x16xi1>
      %168 = arith.andi %167, %166 : vector<8x16xi1>
      %169 = arith.extui %168 : vector<8x16xi1> to vector<8x16xi32>
      %cst_57 = arith.constant dense<0> : vector<16xi32>
      %170 = vector.multi_reduction <add>, %169, %cst_57 [0] : vector<8x16xi32> to vector<16xi32>
      %171 = vector.shape_cast %170 : vector<16xi32> to vector<1x16xi32>
      %c0_i32_58 = arith.constant 0 : i32
      %172 = vector.broadcast %c0_i32_58 : i32 to vector<1x16xi32>
      %173 = arith.cmpi sgt, %171, %172 : vector<1x16xi32>
      %174 = vector.broadcast %cst_5 : f32 to vector<1x16xf32>
      %175 = arith.select %173, %174, %162 : vector<1x16xi1>, vector<1x16xf32>
      %176 = vector.broadcast %149 : f32 to vector<1x16xf32>
      %177 = arith.cmpf oeq, %175, %176 : vector<1x16xf32>
      %c16_i32_59 = arith.constant 16 : i32
      %178 = vector.broadcast %c16_i32_59 : i32 to vector<1x16xi32>
      %179 = arith.select %177, %10, %178 : vector<1x16xi1>, vector<1x16xi32>
      %180 = vector.shape_cast %179 : vector<1x16xi32> to vector<1x1x16xi32>
      %cst_60 = arith.constant dense<2147483647> : vector<1xi32>
      %181 = vector.multi_reduction <minsi>, %180, %cst_60 [1, 2] : vector<1x1x16xi32> to vector<1xi32>
      %182 = vector.shape_cast %181 : vector<1xi32> to vector<1x1x1xi32>
      %183 = vector.extract %182[0, 0, 0] : i32 from vector<1x1x1xi32>
      %184 = vector.broadcast %183 : i32 to vector<1x16xi32>
      %185 = arith.cmpi eq, %10, %184 : vector<1x16xi32>
      %186 = arith.ori %185, %173 : vector<1x16xi1>
      %187 = vector.broadcast %cst_5 : f32 to vector<1x16xf32>
      %188 = arith.select %186, %187, %162 : vector<1x16xi1>, vector<1x16xf32>
      %189 = vector.shape_cast %188 : vector<1x16xf32> to vector<1x1x16xf32>
      %cst_61 = arith.constant dense<0xFF800000> : vector<1xf32>
      %190 = vector.multi_reduction <maximumf>, %189, %cst_61 [1, 2] : vector<1x1x16xf32> to vector<1xf32>
      %191 = vector.shape_cast %190 : vector<1xf32> to vector<1x1x1xf32>
      %192 = vector.extract %191[0, 0, 0] : f32 from vector<1x1x1xf32>
      %193 = vector.broadcast %157 : i32 to vector<4x16xi32>
      %194 = arith.cmpi eq, %8, %193 : vector<4x16xi32>
      %195 = vector.broadcast %192 : f32 to vector<4x16xf32>
      %196 = arith.select %194, %195, %arg4 : vector<4x16xi1>, vector<4x16xf32>
      %197 = vector.broadcast %arg3 : i32 to vector<8x1xi32>
      %198 = arith.cmpi eq, %13, %197 : vector<8x1xi32>
      %199 = vector.broadcast %157 : i32 to vector<8x1xi32>
      %200 = arith.select %198, %199, %arg5 : vector<8x1xi1>, vector<8x1xi32>
      %201 = vector.broadcast %arg3 : i32 to vector<8x1xi32>
      %202 = arith.cmpi eq, %13, %201 : vector<8x1xi32>
      %203 = vector.broadcast %183 : i32 to vector<8x1xi32>
      %204 = arith.select %202, %203, %arg6 : vector<8x1xi1>, vector<8x1xi32>
      %205 = vector.broadcast %arg3 : i32 to vector<8x1xi32>
      %206 = arith.cmpi eq, %13, %205 : vector<8x1xi32>
      %207 = vector.broadcast %149 : f32 to vector<8x1xf32>
      %208 = arith.select %206, %207, %arg7 : vector<8x1xi1>, vector<8x1xf32>
      scf.yield %196, %200, %204, %208 : vector<4x16xf32>, vector<8x1xi32>, vector<8x1xi32>, vector<8x1xf32>
    }
    %c8_i32_6 = arith.constant 8 : i32
    %c16_i32_7 = arith.constant 16 : i32
    %20 = vector.broadcast %c16_i32_7 : i32 to vector<8x1xi32>
    %21 = arith.muli %19#1, %20 : vector<8x1xi32>
    %22 = arith.addi %21, %19#2 : vector<8x1xi32>
    %c256_i32 = arith.constant 256 : i32
    %c0_i32_8 = arith.constant 0 : i32
    %23 = arith.cmpi eq, %c256_i32, %c0_i32_8 : i32
    %c1_i32_9 = arith.constant 1 : i32
    %24 = arith.select %23, %c1_i32_9, %c256_i32 : i32
    %25 = vector.broadcast %24 : i32 to vector<8x1xi32>
    %26 = arith.remsi %22, %25 : vector<8x1xi32>
    %c0_i32_10 = arith.constant 0 : i32
    %27 = vector.broadcast %c0_i32_10 : i32 to vector<8x1xi32>
    %28 = arith.cmpi ne, %26, %27 : vector<8x1xi32>
    %c0_i32_11 = arith.constant 0 : i32
    %29 = vector.broadcast %c0_i32_11 : i32 to vector<8x1xi32>
    %30 = arith.cmpi slt, %26, %29 : vector<8x1xi32>
    %c0_i32_12 = arith.constant 0 : i32
    %31 = arith.cmpi slt, %24, %c0_i32_12 : i32
    %32 = vector.broadcast %31 : i1 to vector<8x1xi1>
    %33 = vector.broadcast %32 : vector<8x1xi1> to vector<8x1xi1>
    %34 = arith.xori %30, %33 : vector<8x1xi1>
    %35 = arith.andi %34, %28 : vector<8x1xi1>
    %36 = vector.broadcast %24 : i32 to vector<8x1xi32>
    %37 = arith.addi %26, %36 : vector<8x1xi32>
    %38 = arith.select %35, %37, %26 : vector<8x1xi1>, vector<8x1xi32>
    %39 = arith.sitofp %22 : vector<8x1xi32> to vector<8x1xf32>
    %cst_13 = arith.constant 2.560000e+02 : f32
    %40 = vector.broadcast %cst_13 : f32 to vector<8x1xf32>
    %41 = arith.divf %39, %40 : vector<8x1xf32>
    %42 = arith.sitofp %38 : vector<8x1xi32> to vector<8x1xf32>
    %cst_14 = arith.constant 1.600000e+01 : f32
    %43 = vector.broadcast %cst_14 : f32 to vector<8x1xf32>
    %44 = arith.divf %42, %43 : vector<8x1xf32>
    %c16_i32_15 = arith.constant 16 : i32
    %c0_i32_16 = arith.constant 0 : i32
    %45 = arith.cmpi eq, %c16_i32_15, %c0_i32_16 : i32
    %c1_i32_17 = arith.constant 1 : i32
    %46 = arith.select %45, %c1_i32_17, %c16_i32_15 : i32
    %47 = vector.broadcast %46 : i32 to vector<8x1xi32>
    %48 = arith.remsi %38, %47 : vector<8x1xi32>
    %c0_i32_18 = arith.constant 0 : i32
    %49 = vector.broadcast %c0_i32_18 : i32 to vector<8x1xi32>
    %50 = arith.cmpi ne, %48, %49 : vector<8x1xi32>
    %c0_i32_19 = arith.constant 0 : i32
    %51 = vector.broadcast %c0_i32_19 : i32 to vector<8x1xi32>
    %52 = arith.cmpi slt, %48, %51 : vector<8x1xi32>
    %c0_i32_20 = arith.constant 0 : i32
    %53 = arith.cmpi slt, %46, %c0_i32_20 : i32
    %54 = vector.broadcast %53 : i1 to vector<8x1xi1>
    %55 = vector.broadcast %54 : vector<8x1xi1> to vector<8x1xi1>
    %56 = arith.xori %52, %55 : vector<8x1xi1>
    %57 = arith.andi %56, %50 : vector<8x1xi1>
    %58 = vector.broadcast %46 : i32 to vector<8x1xi32>
    %59 = arith.addi %48, %58 : vector<8x1xi32>
    %60 = arith.select %57, %59, %48 : vector<8x1xi1>, vector<8x1xi32>
    %61 = arith.sitofp %60 : vector<8x1xi32> to vector<8x1xf32>
    %c16_i32_21 = arith.constant 16 : i32
    %c0_i32_22 = arith.constant 0 : i32
    %62 = arith.cmpi eq, %c16_i32_21, %c0_i32_22 : i32
    %c1_i32_23 = arith.constant 1 : i32
    %63 = arith.select %62, %c1_i32_23, %c16_i32_21 : i32
    %64 = vector.broadcast %63 : i32 to vector<8x1xi32>
    %65 = arith.remsi %19#1, %64 : vector<8x1xi32>
    %c0_i32_24 = arith.constant 0 : i32
    %66 = vector.broadcast %c0_i32_24 : i32 to vector<8x1xi32>
    %67 = arith.cmpi ne, %65, %66 : vector<8x1xi32>
    %c0_i32_25 = arith.constant 0 : i32
    %68 = vector.broadcast %c0_i32_25 : i32 to vector<8x1xi32>
    %69 = arith.cmpi slt, %65, %68 : vector<8x1xi32>
    %c0_i32_26 = arith.constant 0 : i32
    %70 = arith.cmpi slt, %63, %c0_i32_26 : i32
    %71 = vector.broadcast %70 : i1 to vector<8x1xi1>
    %72 = vector.broadcast %71 : vector<8x1xi1> to vector<8x1xi1>
    %73 = arith.xori %69, %72 : vector<8x1xi1>
    %74 = arith.andi %73, %67 : vector<8x1xi1>
    %75 = vector.broadcast %63 : i32 to vector<8x1xi32>
    %76 = arith.addi %65, %75 : vector<8x1xi32>
    %77 = arith.select %74, %76, %65 : vector<8x1xi1>, vector<8x1xi32>
    %78 = vector.broadcast %77 : vector<8x1xi32> to vector<8x16xi32>
    %79 = arith.cmpi eq, %12, %78 : vector<8x16xi32>
    %80 = arith.extui %79 : vector<8x16xi1> to vector<8x16xi32>
    %81 = arith.sitofp %80 : vector<8x16xi32> to vector<8x16xf32>
    %82 = vector.broadcast %19#2 : vector<8x1xi32> to vector<8x16xi32>
    %83 = arith.cmpi eq, %11, %82 : vector<8x16xi32>
    %84 = arith.extui %83 : vector<8x16xi1> to vector<8x16xi32>
    %85 = arith.sitofp %84 : vector<8x16xi32> to vector<8x16xf32>
    %86 = vector.extract_strided_slice %1 {offsets = [4, 0, 0], sizes = [1, 16, 16], strides = [1, 1, 1]} : vector<8x16x16xf32> to vector<1x16x16xf32>
    %87 = vector.shape_cast %86 : vector<1x16x16xf32> to vector<16x16xf32>
    %cst_27 = arith.constant dense<0.000000e+00> : vector<8x16xf32>
    %88 = tpu.matmul %81, %87, %cst_27 {dimension_numbers = #tpu.dot_dimension_numbers<[1], [0], [0], [1], [0, 0, 1, 1], [], []>} : vector<8x16xf32>, vector<16x16xf32>, vector<8x16xf32> -> vector<8x16xf32>
    %89 = arith.mulf %88, %85 : vector<8x16xf32>
    %cst_28 = arith.constant dense<0.000000e+00> : vector<8xf32>
    %90 = vector.multi_reduction <add>, %89, %cst_28 [1] : vector<8x16xf32> to vector<8xf32>
    %91 = vector.shape_cast %90 : vector<8xf32> to vector<8x1xf32>
    %92 = vector.extract_strided_slice %1 {offsets = [5, 0, 0], sizes = [1, 16, 16], strides = [1, 1, 1]} : vector<8x16x16xf32> to vector<1x16x16xf32>
    %93 = vector.shape_cast %92 : vector<1x16x16xf32> to vector<16x16xf32>
    %cst_29 = arith.constant dense<0.000000e+00> : vector<8x16xf32>
    %94 = tpu.matmul %81, %93, %cst_29 {dimension_numbers = #tpu.dot_dimension_numbers<[1], [0], [0], [1], [0, 0, 1, 1], [], []>} : vector<8x16xf32>, vector<16x16xf32>, vector<8x16xf32> -> vector<8x16xf32>
    %95 = arith.mulf %94, %85 : vector<8x16xf32>
    %cst_30 = arith.constant dense<0.000000e+00> : vector<8xf32>
    %96 = vector.multi_reduction <add>, %95, %cst_30 [1] : vector<8x16xf32> to vector<8xf32>
    %97 = vector.shape_cast %96 : vector<8xf32> to vector<8x1xf32>
    %98 = vector.extract_strided_slice %1 {offsets = [6, 0, 0], sizes = [1, 16, 16], strides = [1, 1, 1]} : vector<8x16x16xf32> to vector<1x16x16xf32>
    %99 = vector.shape_cast %98 : vector<1x16x16xf32> to vector<16x16xf32>
    %cst_31 = arith.constant dense<0.000000e+00> : vector<8x16xf32>
    %100 = tpu.matmul %81, %99, %cst_31 {dimension_numbers = #tpu.dot_dimension_numbers<[1], [0], [0], [1], [0, 0, 1, 1], [], []>} : vector<8x16xf32>, vector<16x16xf32>, vector<8x16xf32> -> vector<8x16xf32>
    %101 = arith.mulf %100, %85 : vector<8x16xf32>
    %cst_32 = arith.constant dense<0.000000e+00> : vector<8xf32>
    %102 = vector.multi_reduction <add>, %101, %cst_32 [1] : vector<8x16xf32> to vector<8xf32>
    %103 = vector.shape_cast %102 : vector<8xf32> to vector<8x1xf32>
    %104 = vector.extract_strided_slice %1 {offsets = [7, 0, 0], sizes = [1, 16, 16], strides = [1, 1, 1]} : vector<8x16x16xf32> to vector<1x16x16xf32>
    %105 = vector.shape_cast %104 : vector<1x16x16xf32> to vector<16x16xf32>
    %cst_33 = arith.constant dense<0.000000e+00> : vector<8x16xf32>
    %106 = tpu.matmul %81, %105, %cst_33 {dimension_numbers = #tpu.dot_dimension_numbers<[1], [0], [0], [1], [0, 0, 1, 1], [], []>} : vector<8x16xf32>, vector<16x16xf32>, vector<8x16xf32> -> vector<8x16xf32>
    %107 = arith.mulf %106, %85 : vector<8x16xf32>
    %cst_34 = arith.constant dense<0.000000e+00> : vector<8xf32>
    %108 = vector.multi_reduction <add>, %107, %cst_34 [1] : vector<8x16xf32> to vector<8xf32>
    %109 = vector.shape_cast %108 : vector<8xf32> to vector<8x1xf32>
    %110 = arith.addf %61, %103 : vector<8x1xf32>
    %111 = arith.addf %44, %109 : vector<8x1xf32>
    %cst_35 = arith.constant 5.000000e-01 : f32
    %112 = vector.broadcast %cst_35 : f32 to vector<8x1xf32>
    %113 = arith.mulf %112, %91 : vector<8x1xf32>
    %cst_36 = arith.constant 5.000000e-01 : f32
    %114 = vector.broadcast %cst_36 : f32 to vector<8x1xf32>
    %115 = arith.mulf %114, %97 : vector<8x1xf32>
    %116 = arith.subf %110, %113 : vector<8x1xf32>
    %cst_37 = arith.constant 4.000000e+00 : f32
    %117 = vector.broadcast %cst_37 : f32 to vector<8x1xf32>
    %118 = arith.mulf %116, %117 : vector<8x1xf32>
    %c0_38 = arith.constant 0 : index
    %c0_39 = arith.constant 0 : index
    %c0_40 = arith.constant 0 : index
    %119 = vector.load %arg2[%c0_38, %c0_39, %c0_40] : memref<1x8x6xf32, #tpu.memory_space<vmem>>, vector<1x8x1xf32>
    %120 = vector.shape_cast %119 : vector<1x8x1xf32> to vector<8x1xf32>
    %121 = vector.shape_cast %118 : vector<8x1xf32> to vector<1x8x1xf32>
    tpu.vector_store %arg2[%c0_38, %c0_39, %c0_40], %121 {strides = array<i32>} : memref<1x8x6xf32, #tpu.memory_space<vmem>>, vector<1x8x1xf32>,
    %122 = arith.subf %111, %115 : vector<8x1xf32>
    %cst_41 = arith.constant 4.000000e+00 : f32
    %123 = vector.broadcast %cst_41 : f32 to vector<8x1xf32>
    %124 = arith.mulf %122, %123 : vector<8x1xf32>
    %c0_42 = arith.constant 0 : index
    %c0_43 = arith.constant 0 : index
    %c1 = arith.constant 1 : index
    %125 = vector.load %arg2[%c0_42, %c0_43, %c1] : memref<1x8x6xf32, #tpu.memory_space<vmem>>, vector<1x8x1xf32>
    %126 = vector.shape_cast %125 : vector<1x8x1xf32> to vector<8x1xf32>
    %127 = vector.shape_cast %124 : vector<8x1xf32> to vector<1x8x1xf32>
    tpu.vector_store %arg2[%c0_42, %c0_43, %c1], %127 {strides = array<i32>} : memref<1x8x6xf32, #tpu.memory_space<vmem>>, vector<1x8x1xf32>,
    %128 = arith.addf %110, %113 : vector<8x1xf32>
    %cst_44 = arith.constant 4.000000e+00 : f32
    %129 = vector.broadcast %cst_44 : f32 to vector<8x1xf32>
    %130 = arith.mulf %128, %129 : vector<8x1xf32>
    %c0_45 = arith.constant 0 : index
    %c0_46 = arith.constant 0 : index
    %c2 = arith.constant 2 : index
    %131 = vector.load %arg2[%c0_45, %c0_46, %c2] : memref<1x8x6xf32, #tpu.memory_space<vmem>>, vector<1x8x1xf32>
    %132 = vector.shape_cast %131 : vector<1x8x1xf32> to vector<8x1xf32>
    %133 = vector.shape_cast %130 : vector<8x1xf32> to vector<1x8x1xf32>
    tpu.vector_store %arg2[%c0_45, %c0_46, %c2], %133 {strides = array<i32>} : memref<1x8x6xf32, #tpu.memory_space<vmem>>, vector<1x8x1xf32>,
    %134 = arith.addf %111, %115 : vector<8x1xf32>
    %cst_47 = arith.constant 4.000000e+00 : f32
    %135 = vector.broadcast %cst_47 : f32 to vector<8x1xf32>
    %136 = arith.mulf %134, %135 : vector<8x1xf32>
    %c0_48 = arith.constant 0 : index
    %c0_49 = arith.constant 0 : index
    %c3 = arith.constant 3 : index
    %137 = vector.load %arg2[%c0_48, %c0_49, %c3] : memref<1x8x6xf32, #tpu.memory_space<vmem>>, vector<1x8x1xf32>
    %138 = vector.shape_cast %137 : vector<1x8x1xf32> to vector<8x1xf32>
    %139 = vector.shape_cast %136 : vector<8x1xf32> to vector<1x8x1xf32>
    tpu.vector_store %arg2[%c0_48, %c0_49, %c3], %139 {strides = array<i32>} : memref<1x8x6xf32, #tpu.memory_space<vmem>>, vector<1x8x1xf32>,
    %c0_50 = arith.constant 0 : index
    %c0_51 = arith.constant 0 : index
    %c4 = arith.constant 4 : index
    %140 = vector.load %arg2[%c0_50, %c0_51, %c4] : memref<1x8x6xf32, #tpu.memory_space<vmem>>, vector<1x8x1xf32>
    %141 = vector.shape_cast %140 : vector<1x8x1xf32> to vector<8x1xf32>
    %142 = vector.shape_cast %41 : vector<8x1xf32> to vector<1x8x1xf32>
    tpu.vector_store %arg2[%c0_50, %c0_51, %c4], %142 {strides = array<i32>} : memref<1x8x6xf32, #tpu.memory_space<vmem>>, vector<1x8x1xf32>,
    %c0_52 = arith.constant 0 : index
    %c0_53 = arith.constant 0 : index
    %c5 = arith.constant 5 : index
    %143 = vector.load %arg2[%c0_52, %c0_53, %c5] : memref<1x8x6xf32, #tpu.memory_space<vmem>>, vector<1x8x1xf32>
    %144 = vector.shape_cast %143 : vector<1x8x1xf32> to vector<8x1xf32>
    %145 = vector.shape_cast %19#3 : vector<8x1xf32> to vector<1x8x1xf32>
    tpu.vector_store %arg2[%c0_52, %c0_53, %c5], %145 {strides = array<i32>} : memref<1x8x6xf32, #tpu.memory_space<vmem>>, vector<1x8x1xf32>,
    return
  }
  func.func @transform_0(%arg0: i32) -> (i32, i32, i32, i32) {
    %c0_i32 = arith.constant 0 : i32
    %c0_i32_0 = arith.constant 0 : i32
    %c0_i32_1 = arith.constant 0 : i32
    %c0_i32_2 = arith.constant 0 : i32
    return %arg0, %c0_i32, %c0_i32_0, %c0_i32_1 : i32, i32, i32, i32
  }
  func.func @transform_1(%arg0: i32) -> (i32, i32, i32) {
    %c0_i32 = arith.constant 0 : i32
    %c0_i32_0 = arith.constant 0 : i32
    %c0_i32_1 = arith.constant 0 : i32
    return %arg0, %c0_i32, %c0_i32_0 : i32, i32, i32
  }
}

</mosaic_0001>

<bundles_post_ra>
// kernel: tpu_custom_call.1
= control target key start
LH: loop header
LB: loop body
LE: loop exit
PB: predicated region body
PF: predicated region fallthrough
CT: control target
= control target key end

     0   :  { %6 = vsyncpa [#allocation3], 0  ;;  %s1504_s0 = inlined_call_operand.hbm [shape: f32[2,8,16,16], index: 0, kind: input, shape index: {}]   ;;  %s1505_s1 = inlined_call_operand.vmem [shape: f32[2,8,6], index: 1, kind: output, shape index: {}]  }
   0x1   :  { %8 = vsyncpa [#allocation3 + $0x1], 0  ;;  %s1190_s6 = smov 0   ;;  %s1192_s7 = smov 0  }
   0x2   :  { %s1194_s8 = smov 0   ;;  %s1196_s9 = smov 0  }
   0x3 LB: > { %s1209_s10 = sadd.s32 4294967295, %s1150_s9   ;;  %s1212_s11 = sadd.s32 1, %s1150_s9   ;;  %s1150_s9 = sphi %s1196_s9, %s1521_s9   ;;  %s1146_s8 = sphi %s1194_s8, %s1520_s8   ;;  %s1142_s7 = sphi %s1192_s7, %s1519_s7   ;;  %s1138_s6 = sphi %s1190_s6, %s1518_s6  }
   0x4   : > { %s18_s12 = ssub.s32 %s1150_s9, %s1212_s11  ;;  %s21_s13 = sadd.s32 1, %s1146_s8 }
   0x5   : > { %p19_p0 = scmp.eq.s32.totalorder %s18_s12, 0  ;;  %p28_p1 = scmp.ne.s32.totalorder %s1146_s8, %s1142_s7 }
   0x6   : > { %p29_p2 = scmp.eq.s32.totalorder %s1150_s9, 0  ;;  %p34_p3 = scmp.ne.s32.totalorder %s1142_s7, %s1138_s6 }
   0x7   : > { %s1222_s14 = scalar_select %p19_p0, %s1146_s8, %s21_s13  }
   0x8   : > { %p30_p4 = por %p29_p2, %p28_p1  ;;  %p35_p5 = scmp.eq.s32.totalorder %s1209_s10, 0 }
   0x9   : > { %p988_p6 = scmp.lt.s32.totalorder %s1150_s9, 2  ;;  %s84_s16 = sand.u32 1, %s1146_s8  }
   0xa   : > { %p1226_p7 = por %p35_p5, %p34_p3  ;;  %s886_s17 = sshll.u32 %s84_s16, 7 }
   0xb   : > { %s905_s18 = sshll.u32 %s1150_s9, 11  ;;  %s88_s22 = scalar_lea.vmem [#allocation2], %s886_s17 }
   0xc   : > { %s1507_s15 = scalar_select %p1226_p7, 1, 0 }
   0xd   : > { %s1235_s21 = scalar_lea.hbm %s1504_s0, %s905_s18  ;;  %s95_s23 = sshll.u32 %s88_s22, 4  ;;  %s1237_s23 = int_to_ptr.vmem [resolvable:$true] %s95_s23 }
   0xe   : > { %p1239_p8 = pnand %p988_p6, %p30_p4  ;;  %s1244_s25 = scalar_lea.sflag [#allocation3], %s84_s16 }
   0xf   : > { %s1068_s26 = scalar_lea.hbm %s1235_s21, 2048  ;;  %s1073_s29 = scalar_lea.hbm %s1504_s0, 4096 }
  0x10   : > { %p1069_p10 = scmp.ne.s32.totalorder %s1235_s21, %s1068_s26  ;;  %p1070_p11 = pneg %p1239_p8 }
  0x11   : > { %p1074_p0 = scmp.lt.s32.totalorder %s1235_s21, %s1504_s0  ;;  %p1075_p1 = scmp.lt.s32.totalorder %s1073_s29, %s1068_s26 }
  0x12   : > { %p1071_p12 = pnand %p1070_p11, %p1069_p10 }
  0x13   : > { %p1076_p2 = por %p1075_p1, %p1074_p0 }
  0x14   : > { %p1072_p13 = pneg %p1071_p12 }
  0x16   : > { %p1077_p3 = pnand %p1076_p2, %p1072_p13 }
  0x18   : > { %1080 = shalt.err (!%p1077_p3)
}
  0x19   : > { %s1081_s3 = scalar_lea.vmem %s1237_s23, 2048  ;;  %s1172_s4 = smov [#allocation2]  }
  0x1a   : > { %p1082_p4 = scmp.ne.s32.totalorder %s1237_s23, %s1081_s3  ;;  %s1086_s5 = sshll.u32 %s1172_s4, 4  ;;  %s1087_s5 = int_to_ptr.vmem [resolvable:$false] %s1086_s5 }
  0x1b   : > { %s1088_s6 = scalar_lea.vmem %s1087_s5, 4096  ;;  %p1089_p10 = scmp.lt.s32.totalorder %s1237_s23, %s1087_s5 }
  0x1c   : > { %p1084_p5 = pnand %p1082_p4, %p1070_p11  ;;  %p1090_p12 = scmp.lt.s32.totalorder %s1088_s6, %s1081_s3 }
  0x1e   : > { %p1085_p6 = pneg %p1084_p5  ;;  %p1091_p9 = por %p1090_p12, %p1089_p10 }
  0x20   : > { %p1092_p7 = pnand %p1091_p9, %p1085_p6 }
  0x22   : > { %1095 = shalt.err (!%p1092_p7)
}
  0x23   : > { %s1173_s12 = smov 128   ;;  %s1174_s13 = smov 8  }
  0x24   : > { %987 = dma.hbm_to_vmem [thread:$0]  (!%p1239_p8), %s1235_s21, 2048, %s1237_s23, %s1244_s25, %s1173_s12, %s1173_s12, %s1174_s13  }
  0x25   : > { %p103_p11 = scmp.lt.s32.totalorder %s1150_s9, 3  ;;  %p1509_p13 = scmp.ge.s32.totalorder %s1150_s9, 1 }
  0x27   : > { %p104_p0 = pnand %p1509_p13, %p103_p11 }
  0x28   : > { %s109_s16 = sand.u32 (!%p104_p0), 1, %s1142_s7   ;;  %p1510_p7 = scmp.ne.s32.totalorder (!%p104_p0), %s1507_s15, 0 }
  0x29   : > { %107 = sbr.rel (%p104_p0) target bundleno = 1876 (0x754), region = 24  ;;  %s890_s17 = sshll.u32 (!%p104_p0), %s109_s16, 7 }
  0x2a   : > { %s110_s18 = scalar_lea.sflag (!%p104_p0), [#allocation3], %s109_s16  ;;  %s1269_s19 = scalar_lea.vmem (!%p104_p0), [#allocation2], %s890_s17 }
  0x2e   : > { %1133 = dma.done.wait (%p1510_p7), %s110_s18, 2048  }
  0x2f   : > { %1135 = vsyncadd (%p1510_p7), %s110_s18, 4294965248  ;;  %v151_v0 = vlaneseq  ;;  %v1284_v5 = vld [vmem:[%s1269_s19 + $0x40] sm:$0xff]  ;;  %v1287_v6 = vld [vmem:[%s1269_s19 + $0x48] sm:$0xff]  ;;  %vm157_vm0 = vcmask 130048   ;;  %p131_p8 = scmp.lt.s32.totalorder %s1209_s10, 1  ;;  %vm199_vm1 = vcmask 130112  }
  0x30   : > { %v1290_v7 = vld [vmem:[%s1269_s19 + $0x50] sm:$0xff]  ;;  %v1293_v8 = vld [vmem:[%s1269_s19 + $0x58] sm:$0xff]  ;;  %v1296_v9 = vld [vmem:[%s1269_s19 + $0x60] sm:$0xff]  ;;  %vm228_vm2 = vcmask 1041409   ;;  %vm230_vm3 = vcmask 1042434   ;;  %vm232_vm4 = vcmask 1043459  }
  0x31   : > { %v1275_v1 = vshrl.u32 %v151_v0, 7  ;;  %v1277_v2 = vand.u32 127, %v151_v0  ;;  %v1299_v10 = vld [vmem:[%s1269_s19 + $0x68] sm:$0xff]  ;;  %v1302_v11 = vld [vmem:[%s1269_s19 + $0x70] sm:$0xff]  ;;  %v1305_v12 = vld [vmem:[%s1269_s19 + $0x78] sm:$0xff]  ;;  %s1523_s10 = smov (!%p131_p8, %s1209_s10), 1 }
  0x32   : > { %v1308_v13 = vld [vmem:[%s1269_s19 + $0x10] sm:$0xff]  ;;  %v1313_v15 = vld [vmem:[%s1269_s19] sm:$0xff]  ;;  %v1316_v16 = vld [vmem:[%s1269_s19 + $0x18] sm:$0xff]  ;;  %s891_s9 = sshll.u32 %s1523_s10, 3  ;;  %v1362_v55 = vmov 0.0   ;;  %v1364_v56 = vmov 4294967295  }
  0x33   : > { %v155_v3 = vmul.u32 16, %v1275_v1  ;;  %v164_v14 = vsel %vm157_vm0, %v1308_v13, -inf  ;;  %v1319_v17 = vld [vmem:[%s1269_s19 + $0x8] sm:$0xff]  ;;  %v158_v18 = vsel %vm157_vm0, %v1313_v15, -inf  ;;  %v167_v19 = vsel %vm157_vm0, %v1316_v16, -inf  ;;  %v1331_v22 = vld [vmem:[%s1269_s19 + $0x20] sm:$0xff]  ;;  %s1352_s21 = scalar_lea.vmem %s1505_s1, %s891_s9 }
  0x34   : > { %165 = vmax.xlane.f32.xlu1 %v164_v14  ;;  %159 = vmax.xlane.f32.xlu0 %v158_v18  ;;  %v161_v20 = vsel %vm157_vm0, %v1319_v17, -inf  ;;  %v1328_v21 = vld [vmem:[%s1269_s19 + $0x28] sm:$0xff]  ;;  %v170_v24 = vsel %vm157_vm0, %v1331_v22, -inf  ;;  %v1338_v25 = vld [vmem:[%s1269_s19 + $0x38] sm:$0xff]  ;;  %v1341_v26 = vld [vmem:[%s1269_s19 + $0x30] sm:$0xff]  ;;  %v194_v30 = vadd.s32 4294967288, %v1277_v2  ;;  %v192_v35 = vsub.s32 %v1277_v2, %v1275_v1 }
  0x35   : > { %v1281_v4 = vadd.s32 %v155_v3, %v1277_v2  ;;  %v173_v23 = vsel %vm157_vm0, %v1328_v21, -inf  ;;  %v179_v27 = vsel %vm157_vm0, %v1338_v25, -inf  ;;  %v176_v28 = vsel %vm157_vm0, %v1341_v26, -inf  ;;  %s1370_s10 = smov 0  }
  0x36   : > { %v197_v32 = vsub.s32 %v194_v30, %v1275_v1  ;;  %v1366_v57 = vmov 4294967295  }
  0x38   : > { %168 = vmax.xlane.f32.xlu1 %v167_v19  ;;  %162 = vmax.xlane.f32.xlu0 %v161_v20 }
  0x3c   : > { %174 = vmax.xlane.f32.xlu1 %v173_v23  ;;  %171 = vmax.xlane.f32.xlu0 %v170_v24 }
  0x40   : > { %180 = vmax.xlane.f32.xlu1 %v179_v27  ;;  %177 = vmax.xlane.f32.xlu0 %v176_v28 }
  0xbd   : > { %v166_v29 = vpop.xlane.xlu1 %165  ;;  %v160_v31 = vpop.xlane.xlu0 %159 }
  0xbe   : > { %v204_v41 = vrot.slane %v166_v29, %v192_v35  ;;  %v193_v42 = vrot.slane %v160_v31, %v192_v35 }
  0xc1   : > { %v169_v33 = vpop.xlane.xlu1 %168  ;;  %v163_v34 = vpop.xlane.xlu0 %162 }
  0xc2   : > { %v208_v36 = vrot.slane %v169_v33, %v197_v32  ;;  %v198_v37 = vrot.slane %v163_v34, %v197_v32 }
  0xc4   : > { %v209_v44 = vsel %vm199_vm1, %v208_v36, %v204_v41  ;;  %v200_v45 = vsel %vm199_vm1, %v198_v37, %v193_v42 }
  0xc5   : > { %v175_v38 = vpop.xlane.xlu1 %174  ;;  %v172_v40 = vpop.xlane.xlu0 %171  ;;  %v229_v51 = vsel %vm228_vm2, %v209_v44, %v200_v45 }
  0xc6   : > { %v217_v39 = vrot.slane %v175_v38, %v197_v32  ;;  %v213_v43 = vrot.slane %v172_v40, %v192_v35 }
  0xc8   : > { %v218_v47 = vsel %vm199_vm1, %v217_v39, %v213_v43 }
  0xc9   : > { %v181_v46 = vpop.xlane.xlu1 %180  ;;  %v178_v49 = vpop.xlane.xlu0 %177  ;;  %v231_v52 = vsel %vm230_vm3, %v218_v47, %v229_v51 }
  0xca   : > { %v226_v48 = vrot.slane %v181_v46, %v197_v32  ;;  %v222_v50 = vrot.slane %v178_v49, %v192_v35 }
  0xcc   : > { %v227_v53 = vsel %vm199_vm1, %v226_v48, %v222_v50 }
  0xcd   : > { %v233_v54 = vsel %vm232_vm4, %v227_v53, %v231_v52  }
  0xce LB: >> { %vm245_vm5 = vcmask 125952   ;;  %v422_v14 = vstv %s1170_s10  ;;  %v1175_v33 = vmov 0.0   ;;  %vm1176_vm9 = vmmov 0   ;;  %s240_s10 = sadd.s32 1, %s1170_s10   ;;  %s1170_s10 = sphi %s1370_s10, %s240_s10   ;;  %v1166_v54 = vphi %v233_v54, %v421_v54   ;;  %v1162_v57 = vphi %v1366_v57, %v1517_v57   ;;  %v1158_v56 = vphi %v1364_v56, %v1516_v56   ;;  %v1154_v55 = vphi %v1362_v55, %v1515_v55  }
  0xcf   : >> { %v246_v58 = vsel %vm245_vm5, %v1166_v54, -inf  ;;  %vm1389_vm6 = vcmp.eq.s32.totalorder %v1275_v1, %v422_v14  ;;  %927 = vmatprep.subr.mxu0 %v1175_v33  ;;  %943 = vmatprep.mubr.msk.f32.mxu0 %vm1176_vm9, %v1175_v33  ;;  %vm288_vm13 = vcmask 523264   ;;  %vm363_vm1 = vcmp.eq.s32.totalorder %v1277_v2, %v1158_v56  ;;  %p237_p9 = scmp.ge.s32.totalorder %s240_s10, 8  }
  0xd0   : >> { %247 = vmax.xlane.f32.xlu0 %v246_v58  ;;  %928 = vmatpush3.msra.mxu0 %v1338_v25  ;;  %v1177_v48 = vmov 0   ;;  %vm379_vm4 = vcmask 122880  }
  0xd1   : >> { %929 = vmatprep.subr.mxu0 %v1175_v33 }
  0xd2   : >> { %930 = vmatpush3.msra.mxu0 %v1341_v26 }
  0xd3   : >> { %931 = vmatprep.subr.mxu0 %v1175_v33 }
  0xd4   : >> { %932 = vmatpush3.msra.mxu0 %v1328_v21 }
  0xd5   : >> { %933 = vmatprep.subr.mxu0 %v1175_v33 }
  0xd6   : >> { %934 = vmatpush3.msra.mxu0 %v1331_v22 }
  0xd7   : >> { %935 = vmatprep.subr.mxu0 %v1175_v33 }
  0xd8   : >> { %936 = vmatpush3.msra.mxu0 %v1316_v16 }
  0xd9   : >> { %937 = vmatprep.subr.mxu0 %v1175_v33 }
  0xda   : >> { %938 = vmatpush3.msra.mxu0 %v1308_v13 }
  0xdb   : >> { %939 = vmatprep.subr.mxu0 %v1175_v33 }
  0xdc   : >> { %940 = vmatpush3.msra.mxu0 %v1319_v17 }
  0xdd   : >> { %941 = vmatprep.subr.mxu0 %v1175_v33 }
  0xde   : >> { %942 = vmatpush3.msra.mxu0 %v1313_v15 }
 0x159   : >> { %v248_v59 = vpop.xlane.xlu0 %247 }
 0x15a   : >> { %v249_v60 = vrot.slane %v248_v59, 4 }
 0x15c   : >> { %v250_v61 = vmax.f32 %v248_v59, %v249_v60 }
 0x15e   : >> { %v251_v62 = vrot.slane %v250_v61, 2 }
 0x160   : >> { %v252_v63 = vmax.f32 %v250_v61, %v251_v62 }
 0x162   : >> { %v253_v0 = vrot.slane %v252_v63, 1 }
 0x164   : >> { %v254_v3 = vmax.f32 %v252_v63, %v253_v0 }
 0x166   : >> { %974 = vpush %v254_v3 }
 0x197   : >> { %s975_s22 = spop %974 }
 0x198   : >> { %v1393_v19 = vstv %s975_s22 }
 0x199   : >> { %vm257_vm7 = vcmp.eq.f32.partialorder %v1166_v54, %v1393_v19  ;;  %v1400_v55 = vsel %vm1389_vm6, %v1393_v19, %v1154_v55  }
 0x19a   : >> { %v1513_v20 = vmov %v1400_v55  ;;  %v258_v23 = vsel %vm257_vm7, %v1281_v4, 64 }
 0x19b   : >> { %v259_v24 = vsel %vm245_vm5, %v258_v23, 2147483647 }
 0x19c   : >> { %v261_v27 = vshra.s32 %v259_v24, 16  ;;  %v260_v29 = vand.u32 65535, %v259_v24 }
 0x19e   : >> { %v263_v28 = vcvt.s32.f32 %v261_v27  ;;  %v262_v31 = vcvt.s32.f32 %v260_v29 }
 0x1a0   : >> { %264 = vmin.xlane.f32.xlu0 %v263_v28 }
 0x229   : >> { %v265_v30 = vpop.xlane.xlu0 %264 }
 0x22a   : >> { %vm266_vm8 = vcmp.eq.f32.partialorder %v263_v28, %v265_v30  ;;  %v271_v34 = vcvt.f32.s32 %v265_v30 }
 0x22b   : >> { %v267_v32 = vsel %vm266_vm8, %v262_v31, inf }
 0x22c   : >> { %268 = vmin.xlane.f32.xlu1 %v267_v32  ;;  %v272_v36 = vshll.u32 %v271_v34, 16 }
 0x2b5   : >> { %v269_v35 = vpop.xlane.xlu1 %268 }
 0x2b6   : >> { %v270_v37 = vcvt.f32.s32 %v269_v35 }
 0x2b8   : >> { %v273_v38 = vadd.s32 %v272_v36, %v270_v37 }
 0x2ba   : >> { %v274_v39 = vrot.slane %v273_v38, 4 }
 0x2bc   : >> { %vm275_vm10 = vcmp.lt.s32.totalorder %v273_v38, %v274_v39 }
 0x2bd   : >> { %v276_v40 = vsel %vm275_vm10, %v273_v38, %v274_v39 }
 0x2be   : >> { %v277_v41 = vrot.slane %v276_v40, 2 }
 0x2c0   : >> { %vm278_vm11 = vcmp.lt.s32.totalorder %v276_v40, %v277_v41 }
 0x2c1   : >> { %v279_v42 = vsel %vm278_vm11, %v276_v40, %v277_v41 }
 0x2c2   : >> { %v280_v43 = vrot.slane %v279_v42, 1 }
 0x2c4   : >> { %vm281_vm12 = vcmp.lt.s32.totalorder %v279_v42, %v280_v43 }
 0x2c5   : >> { %v282_v44 = vsel %vm281_vm12, %v279_v42, %v280_v43 }
 0x2c6   : >> { %976 = vpush %v282_v44 }
 0x2f7   : >> { %s977_s23 = spop %976 }
 0x2f8   : >> { %v1412_v45 = vstv %s977_s23 }
 0x2f9   : >> { %v1418_v46 = vsel %vm1389_vm6, %v1412_v45, %v1162_v57   ;;  %vm285_vm14 = vcmp.eq.s32.totalorder %v1277_v2, %v1412_v45  ;;  %vm362_vm15 = vcmp.eq.s32.totalorder %v1162_v57, %v1412_v45 }
 0x2fa   : >> { %v892_v47 = vsel %vm285_vm14, 1.0, %v1175_v33  ;;  %vm366_vm2 = vmand %vm362_vm15, %vm363_vm1  ;;  %vm460_vm14 = vcmp.lt.s32.totalorder (%p237_p9), %v1418_v46, 0 }
 0x2fb   : >> { %944 = vmatmul.mubr.msk.f32.vlgmr.msra.gmra.mxu0 %vm288_vm13, %v892_v47  ;;  %v367_v49 = vsel %vm366_vm2, 1, %v1177_v48  ;;  %vm419_vm13 = vcmp.eq.s32.totalorder %v1281_v4, %v1412_v45  ;;  %v461_v45 = vsub.s32 (%p237_p9), 0, %v1418_v46 }
 0x2fc   : >> { %v368_v50 = vsel %vm157_vm0, %v367_v49, 0 }
 0x2fd   : >> { %v369_v51 = vrot.slane %v368_v50, 4 }
 0x2ff   : >> { %v370_v52 = vadd.s32 %v369_v51, %v368_v50  ;;  %v1178_v51 = vmov (%p237_p9), 0.0  }
 0x300   : > { %946 = vmatprep.subr.mxu0 (%p237_p9), %v1178_v51  ;;  %953 = vmatprep.subr.mxu1 (%p237_p9), %v1178_v51 }
 0x301   : >> { %v371_v53 = vrot.slane %v370_v52, 2  ;;  %947 = vmatpush3.msra.mxu0 (%p237_p9), %v1287_v6  ;;  %954 = vmatpush3.msra.mxu1 (%p237_p9), %v1293_v8 }
 0x302   : > { %948 = vmatprep.subr.mxu0 (%p237_p9), %v1178_v51  ;;  %955 = vmatprep.subr.mxu1 (%p237_p9), %v1178_v51 }
 0x303   : >> { %v372_v55 = vadd.s32 %v371_v53, %v370_v52  ;;  %v896_v52 = vmin.u32 (%p237_p9), %v461_v45, %v1418_v46  ;;  %949 = vmatpush3.msra.mxu0 (%p237_p9), %v1284_v5  ;;  %956 = vmatpush3.msra.mxu1 (%p237_p9), %v1290_v7 }
 0x304   : > { %960 = vmatprep.subr.mxu0 (%p237_p9), %v1178_v51  ;;  %967 = vmatprep.subr.mxu1 (%p237_p9), %v1178_v51 }
 0x305   : >> { %v373_v58 = vrot.slane %v372_v55, 1 }
 0x307   : >> { %v374_v59 = vadd.s32 %v373_v58, %v372_v55  ;;  %v1515_v55 = vmov %v1513_v20  ;;  %v427_v58 = vmul.u32 (%p237_p9), 16, %v1418_v46 }
 0x309   : >> { %vm375_vm3 = vcmp.gt.s32.totalorder %v374_v59, 0 }
 0x3bb   : >> { %v358_v60 = vpop.f32.mrf.mxu0 }
 0x3bc   : >> { %v376_v61 = vsel %vm375_vm3, -inf, %v358_v60 }
 0x3bd   : >> { %vm377_vm5 = vcmp.eq.f32.partialorder %v376_v61, %v1393_v19  ;;  %v945_v57 = vpop.f32.mrf.mxu0 }
 0x3be   : >> { %v378_v62 = vsel %vm377_vm5, %v1277_v2, 16  ;;  %v1517_v57 = vmov %v1418_v46 }
 0x3bf   : >> { %v380_v63 = vsel %vm379_vm4, %v378_v62, 2147483647 }
 0x3c0   : >> { %v382_v0 = vshra.s32 %v380_v63, 16  ;;  %v381_v14 = vand.u32 65535, %v380_v63 }
 0x3c2   : >> { %v384_v3 = vcvt.s32.f32 %v382_v0  ;;  %v383_v24 = vcvt.s32.f32 %v381_v14 }
 0x3c4   : >> { %385 = vmin.xlane.f32.xlu1 %v384_v3 }
 0x44d   : >> { %v386_v23 = vpop.xlane.xlu1 %385 }
 0x44e   : >> { %vm387_vm7 = vcmp.eq.f32.partialorder %v384_v3, %v386_v23  ;;  %v392_v28 = vcvt.f32.s32 %v386_v23 }
 0x44f   : >> { %v388_v27 = vsel %vm387_vm7, %v383_v24, inf }
 0x450   : >> { %389 = vmin.xlane.f32.xlu0 %v388_v27  ;;  %v393_v30 = vshll.u32 %v392_v28, 16 }
 0x4d9   : >> { %v390_v29 = vpop.xlane.xlu0 %389 }
 0x4da   : >> { %v391_v31 = vcvt.f32.s32 %v390_v29 }
 0x4dc   : >> { %v394_v32 = vadd.s32 %v393_v30, %v391_v31 }
 0x4de   : >> { %v395_v19 = vrot.slane %v394_v32, 4 }
 0x4e0   : >> { %vm396_vm8 = vcmp.lt.s32.totalorder %v394_v32, %v395_v19 }
 0x4e1   : >> { %v397_v33 = vsel %vm396_vm8, %v394_v32, %v395_v19 }
 0x4e2   : >> { %v398_v34 = vrot.slane %v397_v33, 2 }
 0x4e4   : >> { %vm399_vm9 = vcmp.lt.s32.totalorder %v397_v33, %v398_v34 }
 0x4e5   : >> { %v400_v35 = vsel %vm399_vm9, %v397_v33, %v398_v34 }
 0x4e6   : >> { %v401_v36 = vrot.slane %v400_v35, 1 }
 0x4e8   : >> { %vm402_vm10 = vcmp.lt.s32.totalorder %v400_v35, %v401_v36 }
 0x4e9   : >> { %v403_v37 = vsel %vm402_vm10, %v400_v35, %v401_v36 }
 0x4ea   : >> { %978 = vpush %v403_v37 }
 0x51b   : >> { %s979_s24 = spop %978 }
 0x51c   : >> { %v405_v38 = vstv %s979_s24 }
 0x51d   : >> { %vm406_vm11 = vcmp.eq.s32.totalorder %v1277_v2, %v405_v38  ;;  %v1435_v56 = vsel %vm1389_vm6, %v405_v38, %v1158_v56   ;;  %vm1179_vm6 = vmmov (%p237_p9), 0  }
 0x51e   : >> { %v1514_v39 = vmov %v1435_v56  ;;  %vm407_vm12 = vmor %vm406_vm11, %vm375_vm3  ;;  %950 = vmatprep.mubr.msk.f32.mxu0 (%p237_p9), %vm1179_vm6, %v1178_v51  ;;  %957 = vmatprep.mubr.msk.f32.mxu1 (%p237_p9), %vm1179_vm6, %v1178_v51 }
 0x51f   : >> { %v408_v40 = vsel %vm407_vm12, -inf, %v358_v60  ;;  %v1516_v56 = vmov %v1514_v39  ;;  %v428_v59 = vadd.s32 (%p237_p9), %v427_v58, %v1514_v39 }
 0x520   : >> { %v409_v41 = vsel %vm379_vm4, %v408_v40, -inf  ;;  %vm475_vm4 = vcmp.eq.s32.totalorder (%p237_p9), %v1277_v2, %v1514_v39 }
 0x521   : >> { %410 = vmax.xlane.f32.xlu1 %v409_v41  ;;  %v898_v7 = vsel (%p237_p9), %vm475_vm4, 1.0, %v1178_v51  ;;  %v430_v60 = vsub.s32 (%p237_p9), 0, %v428_v59  ;;  %vm429_vm5 = vcmp.lt.s32.totalorder (%p237_p9), %v428_v59, 0  ;;  %v441_v41 = vcvt.s32.f32 (%p237_p9), %v428_v59 }
 0x523   : > { %v894_v61 = vmin.u32 (%p237_p9), %v430_v60, %v428_v59 }
 0x525   : > { %v433_v57 = vand.u32 (%p237_p9), 255, %v894_v61 }
 0x527   : > { %v434_v62 = vsub.s32 (%p237_p9), 0, %v433_v57 }
 0x529   : > { %v435_v63 = vsel (%p237_p9), %vm429_vm5, %v434_v62, %v433_v57 }
 0x52a   : > { %vm436_vm7 = vcmp.ne.s32.totalorder (%p237_p9), %v435_v63, 0  ;;  %vm437_vm8 = vcmp.lt.s32.totalorder (%p237_p9), %v435_v63, 0  ;;  %v439_v0 = vadd.s32 (%p237_p9), 256, %v435_v63 }
 0x52b   : > { %vm438_vm9 = vmand (%p237_p9), %vm437_vm8, %vm436_vm7 }
 0x52c   : > { %v440_v3 = vsel (%p237_p9), %vm438_vm9, %v439_v0, %v435_v63 }
 0x52d   : > { %v448_v14 = vsub.s32 (%p237_p9), 0, %v440_v3  ;;  %v444_v29 = vcvt.s32.f32 (%p237_p9), %v440_v3 }
 0x52f   : > { %v895_v23 = vmin.u32 (%p237_p9), %v448_v14, %v440_v3  ;;  %v446_v19 = vmul.f32 (%p237_p9), 0.0625, %v444_v29 }
 0x531   : > { %v451_v24 = vand.u32 (%p237_p9), 15, %v895_v23 }
 0x533   : > { %v452_v27 = vsub.s32 (%p237_p9), 0, %v451_v24 }
 0x5aa   : >> { %v411_v42 = vpop.xlane.xlu1 %410 }
 0x5ab   : >> { %v412_v43 = vrot.slane %v411_v42, 4 }
 0x5ad   : >> { %v413_v44 = vmax.f32 %v411_v42, %v412_v43 }
 0x5af   : >> { %v414_v47 = vrot.slane %v413_v44, 2 }
 0x5b1   : >> { %v415_v48 = vmax.f32 %v413_v44, %v414_v47 }
 0x5b3   : >> { %v416_v49 = vrot.slane %v415_v48, 1 }
 0x5b5   : >> { %v417_v50 = vmax.f32 %v415_v48, %v416_v49  ;;  %v443_v49 = vmul.f32 (%p237_p9), 0.00390625, %v441_v41 }
 0x5b7   : >> { %980 = vpush %v417_v50 }
 0x5e6   : > { %239 = sbr.rel (!%p237_p9) target bundleno = 206 (0xce), region = 71 }
 0x5e8   : >> { %s981_s25 = spop %980 }
 0x5e9   : >> { %v420_v18 = vstv %s981_s25 }
 0x5ea   : >> { %v421_v54 = vsel %vm419_vm13, %v420_v18, %v1166_v54   ;;  %vm783_vm13 = vcmask (%p237_p9), 7168  }
 0x5eb   : > { %v464_v54 = vand.u32 15, %v896_v52 }
 0x5ed   : > { %v465_v1 = vsub.s32 0, %v464_v54 }
 0x5ef   : > { %v466_v4 = vsel %vm460_vm14, %v465_v1, %v464_v54  ;;  %vm791_vm14 = vcmask 23568  }
 0x5f0   : > { %vm467_vm15 = vcmp.ne.s32.totalorder %v466_v4, 0  ;;  %vm468_vm1 = vcmp.lt.s32.totalorder %v466_v4, 0  ;;  %v470_v6 = vadd.s32 16, %v466_v4 }
 0x5f1   : > { %vm469_vm2 = vmand %vm468_vm1, %vm467_vm15  ;;  %vm795_vm15 = vcmask 31768   ;;  %vm797_vm1 = vcmask 39968  }
 0x5f2   : > { %v471_v8 = vsel %vm469_vm2, %v470_v6, %v466_v4  ;;  %vm799_vm2 = vcmask 48168  }
 0x5f3   : > { %vm472_vm3 = vcmp.eq.s32.totalorder %v1277_v2, %v471_v8 }
 0x5f4   : > { %v897_v5 = vsel %vm472_vm3, 1.0, %v1178_v51 }
 0x5f5   : > { %951 = vmatmul.mubr.msk.f32.vlgmr.msra.gmra.mxu0 %vm157_vm0, %v897_v5  ;;  %958 = vmatmul.mubr.msk.f32.vlgmr.msra.gmra.mxu1 %vm157_vm0, %v897_v5 }
 0x5f6   : > { %961 = vmatpush3.msra.mxu0 %v1299_v10  ;;  %968 = vmatpush3.msra.mxu1 %v1305_v12 }
 0x5f7   : > { %962 = vmatprep.subr.mxu0 %v1178_v51  ;;  %969 = vmatprep.subr.mxu1 %v1178_v51 }
 0x5f8   : > { %963 = vmatpush3.msra.mxu0 %v1296_v9  ;;  %964 = vmatprep.mubr.msk.f32.mxu0 %vm1179_vm6, %v1178_v51 }
 0x5f9   : > { %970 = vmatpush3.msra.mxu1 %v1302_v11  ;;  %971 = vmatprep.mubr.msk.f32.mxu1 %vm1179_vm6, %v1178_v51  ;;  %vm787_vm6 = vcmask 15368  }
 0x5fa   : > { %965 = vmatmul.mubr.msk.f32.vlgmr.msra.gmra.mxu0 %vm157_vm0, %v897_v5  ;;  %972 = vmatmul.mubr.msk.f32.vlgmr.msra.gmra.mxu1 %vm157_vm0, %v897_v5 }
 0x6b5   : > { %v547_v10 = vpop.f32.mrf.mxu0  ;;  %v621_v12 = vpop.f32.mrf.mxu1 }
 0x6b6   : > { %v625_v13 = vmul.f32 %v898_v7, %v621_v12  ;;  %v551_v15 = vmul.f32 %v898_v7, %v547_v10 }
 0x6b7   : > { %v952_v16 = vpop.f32.mrf.mxu0  ;;  %v959_v9 = vpop.f32.mrf.mxu1 }
 0x6b8   : > { %v626_v17 = vsel %vm157_vm0, %v625_v13, 0.0  ;;  %v552_v11 = vsel %vm157_vm0, %v551_v15, 0.0 }
 0x6b9   : > { %627 = vadd.xlane.f32.xlu1 %v626_v17  ;;  %553 = vadd.xlane.f32.xlu0 %v552_v11 }
 0x6ba   : > { %v769_v21 = vpop.f32.mrf.mxu1  ;;  %v695_v22 = vpop.f32.mrf.mxu0 }
 0x6bb   : > { %v773_v25 = vmul.f32 %v898_v7, %v769_v21  ;;  %v699_v26 = vmul.f32 %v898_v7, %v695_v22 }
 0x6bc   : > { %v966_v56 = vpop.f32.mrf.mxu0  ;;  %v973_v53 = vpop.f32.mrf.mxu1 }
 0x6bd   : > { %v774_v2 = vsel %vm157_vm0, %v773_v25, 0.0  ;;  %v700_v55 = vsel %vm157_vm0, %v699_v26, 0.0  ;;  %vm447_vm0 = vcmp.lt.s32.totalorder %v440_v3, 0 }
 0x6be   : > { %775 = vadd.xlane.f32.xlu1 %v774_v2  ;;  %701 = vadd.xlane.f32.xlu0 %v700_v55  ;;  %v453_v28 = vsel %vm447_vm0, %v452_v27, %v451_v24 }
 0x6bf   : > { %vm454_vm10 = vcmp.ne.s32.totalorder %v453_v28, 0  ;;  %vm455_vm11 = vcmp.lt.s32.totalorder %v453_v28, 0  ;;  %v457_v46 = vadd.s32 16, %v453_v28 }
 0x6c0   : > { %vm456_vm12 = vmand %vm455_vm11, %vm454_vm10 }
 0x6c1   : > { %v458_v30 = vsel %vm456_vm12, %v457_v46, %v453_v28 }
 0x6c2   : > { %v459_v33 = vcvt.s32.f32 %v458_v30 }
 0x742   : > { %v628_v31 = vpop.xlane.xlu1 %627  ;;  %v554_v32 = vpop.xlane.xlu0 %553 }
 0x743   : > { %v780_v36 = vmul.f32 0.5, %v628_v31  ;;  %v779_v37 = vmul.f32 0.5, %v554_v32 }
 0x747   : > { %v776_v34 = vpop.xlane.xlu1 %775  ;;  %v702_v35 = vpop.xlane.xlu0 %701 }
 0x748   : > { %v778_v38 = vadd.f32 %v776_v34, %v446_v19  ;;  %v777_v39 = vadd.f32 %v702_v35, %v459_v33 }
 0x74a   : > { %v785_v40 = vsub.f32 %v778_v38, %v780_v36  ;;  %v781_v42 = vsub.f32 %v777_v39, %v779_v37  ;;  %v789_v43 = vadd.f32 %v779_v37, %v777_v39  ;;  %v793_v44 = vadd.f32 %v780_v36, %v778_v38 }
 0x74c   : > { %v786_v47 = vmul.f32 4.0, %v785_v40  ;;  %v782_v48 = vmul.f32 4.0, %v781_v42  ;;  %v790_v50 = vmul.f32 4.0, %v789_v43  ;;  %v794_v18 = vmul.f32 4.0, %v793_v44 }
 0x74e   : > { %784 = vst.msk [vmem:[%s1352_s21] sm:$0xff] %vm783_vm13, %v782_v48 }
 0x74f   : > { %788 = vst.msk [vmem:[%s1352_s21] sm:$0xff] %vm787_vm6, %v786_v47 }
 0x750   : > { %792 = vst.msk [vmem:[%s1352_s21] sm:$0xff] %vm791_vm14, %v790_v50 }
 0x751   : > { %796 = vst.msk [vmem:[%s1352_s21] sm:$0xff] %vm795_vm15, %v794_v18 }
 0x752   : > { %798 = vst.msk [vmem:[%s1352_s21] sm:$0xff] %vm797_vm1, %v443_v49 }
 0x753   : > { %800 = vst.msk [vmem:[%s1352_s21] sm:$0xff] %vm799_vm2, %v1513_v20 }
 0x754 PF: > { %p11_p1 = scmp.ge.s32.totalorder %s1212_s11, 4   ;;  %s1518_s6 = smov %s1142_s7 }
 0x755   : > { %s1519_s7 = smov %s1146_s8  ;;  %s1520_s8 = smov %s1222_s14 }
 0x756   : > { %s1521_s9 = smov %s1212_s11  ;;  %13 = sbr.rel (!%p11_p1) target bundleno = 3 (0x3), region = 82 }
 0x75b   :  { %820 = vsyncpa [#allocation3], 1 }
 0x75c   :  { %822 = vsyncpa [#allocation3 + $0x1], 1 }

</bundles_post_ra>
